<compile_context>
chip_gen: v7x
topology: tpu7x:2x2x1
jax: 0.10.0
libtpu: 0.0.40
codegen_flags: <defaults>
</compile_context>

<pallas_src>
import jax
import jax.numpy as jnp
from jax.experimental import pallas as pl
from jax.experimental.pallas import tpu as pltpu


_VMEM_LIMIT_BYTES = 32 * 1024 * 1024   # explicit: > v5e's 16 MiB default, < v7x's 64 MiB


# ---------------------------------------------------------------------------
# Kernels
# ---------------------------------------------------------------------------

def _stats_kernel(x_ref, sum_ref, sumsq_ref, acc_s, acc_q):
    """Per-row sum / sum-of-squares.

    grid = (row_tiles, lane_splits, lane_tiles_per_split); the trailing axis is
    the reduction ("arbitrary").  acc_s / acc_q are (rt, 128) VMEM scratch
    accumulators; each tile is folded with per-128-lane VPU adds and the single
    XLU lane-reduce + (rt,1) store happen only on the last lane step.
    """
    j = pl.program_id(2)

    @pl.when(j == 0)
    def _():
        acc_s[...] = jnp.zeros_like(acc_s)
        acc_q[...] = jnp.zeros_like(acc_q)

    n_chunks = x_ref.shape[1] // 128
    for k in range(n_chunks):                      # static, lane-aligned slices
        chunk = x_ref[:, k * 128:(k + 1) * 128].astype(jnp.float32)
        acc_s[...] += chunk
        acc_q[...] += chunk * chunk

    @pl.when(j == pl.num_programs(2) - 1)
    def _():
        sum_ref[0] = jnp.sum(acc_s[...], axis=1, keepdims=True)
        sumsq_ref[0] = jnp.sum(acc_q[...], axis=1, keepdims=True)


def _apply_kernel(x_ref, p_ref, o_ref):
    """out = scale * (x + loc); per-row params fused as p[:, 0]=loc, p[:, 1]=scale."""
    p = p_ref[...].astype(jnp.float32)             # (rt, 2) f32
    loc = p[:, 0:1]
    scale = p[:, 1:2]
    x = x_ref[...].astype(jnp.float32)             # cast in-kernel (v5e: no bf16 VPU)
    o_ref[...] = (scale * (x + loc)).astype(o_ref.dtype)


# ---------------------------------------------------------------------------
# Tiling helpers
# ---------------------------------------------------------------------------

def _round_up(x, m):
    return ((x + m - 1) // m) * m


def _largest_divisor_tile(total, unit, target):
    """Largest multiple of `unit` that divides `total` and is <= max(target, unit)."""
    t = min(total, max(unit, (target // unit) * unit))
    while total % t != 0:
        t -= unit
    return t


def _choose_tiles(nr_pad, hw_pad, itemsize, sub,
                  row_target=256, lane_target=4096, block_bytes=4 << 20):
    rt = _largest_divisor_tile(nr_pad, sub, row_target)
    lt = _largest_divisor_tile(hw_pad, 128, lane_target)
    # Keep a single block <= block_bytes so the double-buffered working set
    # stays comfortably under _VMEM_LIMIT_BYTES on every generation.
    while rt * lt * itemsize > block_bytes and lt > 128:
        lt = _largest_divisor_tile(hw_pad, 128, lt - 128)
    while rt * lt * itemsize > block_bytes and rt > sub:
        rt = _largest_divisor_tile(nr_pad, sub, rt - sub)
    return rt, lt


# ---------------------------------------------------------------------------
# pallas_call wrappers
# ---------------------------------------------------------------------------

def _channel_stats(x2p, n, c, nr, rt, lt):
    """Per-channel sum / sum-of-squares over (N, H, W) from the padded (NR_pad, HW_pad) view."""
    nr_pad, hw_pad = x2p.shape
    itemsize = jnp.dtype(x2p.dtype).itemsize
    n_rt = nr_pad // rt
    n_lt = hw_pad // lt
    # v7x megacore: if only one row tile, split the lane axis into 2 parallel
    # chunks (partial accumulators summed below) so both TensorCores get work.
    n_split = 2 if (n_rt == 1 and n_lt >= 2 and n_lt % 2 == 0) else 1
    n_inner = n_lt // n_split

    sums, sumsqs = pl.pallas_call(
        _stats_kernel,
        out_shape=(
            jax.ShapeDtypeStruct((n_split, nr_pad, 1), jnp.float32),
            jax.ShapeDtypeStruct((n_split, nr_pad, 1), jnp.float32),
        ),
        grid=(n_rt, n_split, n_inner),
        in_specs=[pl.BlockSpec((rt, lt), lambda i, s, j: (i, s * n_inner + j))],
        out_specs=(
            pl.BlockSpec((1, rt, 1), lambda i, s, j: (s, i, 0)),
            pl.BlockSpec((1, rt, 1), lambda i, s, j: (s, i, 0)),
        ),
        scratch_shapes=[
            pltpu.VMEM((rt, 128), jnp.float32),
            pltpu.VMEM((rt, 128), jnp.float32),
        ],
        compiler_params=pltpu.CompilerParams(
            dimension_semantics=("parallel", "parallel", "arbitrary"),
            vmem_limit_bytes=_VMEM_LIMIT_BYTES),
        cost_estimate=pl.CostEstimate(
            flops=3 * nr_pad * hw_pad, transcendentals=0,
            bytes_accessed=nr_pad * hw_pad * itemsize + 2 * n_split * nr_pad * 4),
    )(x2p)

    row_sum = sums.sum(axis=0)[:nr, 0]       # (NR,)  drop padded rows
    row_sumsq = sumsqs.sum(axis=0)[:nr, 0]   # (NR,)
    ch_sum = row_sum.reshape(n, c).sum(axis=0)      # (C,)
    ch_sumsq = row_sumsq.reshape(n, c).sum(axis=0)  # (C,)
    return ch_sum, ch_sumsq


def _apply_affine(x2p, params_rows, rt, lt):
    nr_pad, hw_pad = x2p.shape
    itemsize = jnp.dtype(x2p.dtype).itemsize
    return pl.pallas_call(
        _apply_kernel,
        out_shape=jax.ShapeDtypeStruct((nr_pad, hw_pad), x2p.dtype),
        grid=(nr_pad // rt, hw_pad // lt),
        in_specs=[
            pl.BlockSpec((rt, lt), lambda i, j: (i, j)),   # x (native dtype)
            pl.BlockSpec((rt, 2), lambda i, j: (i, 0)),    # fused (loc, scale) per row
        ],
        out_specs=pl.BlockSpec((rt, lt), lambda i, j: (i, j)),
        compiler_params=pltpu.CompilerParams(
            dimension_semantics=("parallel", "parallel"),
            vmem_limit_bytes=_VMEM_LIMIT_BYTES),
        cost_estimate=pl.CostEstimate(
            flops=2 * nr_pad * hw_pad, transcendentals=0,
            bytes_accessed=2 * nr_pad * hw_pad * itemsize + nr_pad * 8),
    )(x2p, params_rows)


def actnorm_forward(x_nchw, loc_param, scale_param, initialized):
    """ActNorm forward.

    x_nchw:      (N, C, H, W)
    loc_param:   (1, C, 1, 1)
    scale_param: (1, C, 1, 1)
    initialized: Python int (0 -> data-dependent init, like the torch buffer)

    Returns (output (N,C,H,W), logdet scalar, new_loc (1,C,1,1), new_scale (1,C,1,1)).
    """
    N, C, H, W = x_nchw.shape
    HW = H * W
    NR = N * C
    M = N * HW

    dt = x_nchw.dtype
    itemsize = jnp.dtype(dt).itemsize
    sub = max(8, 32 // itemsize)         # sublane multiple: f32->8, bf16->16, int8->32

    # Contiguous view of NCHW as (N*C, H*W) -- no transpose, no extra HBM pass.
    x2 = x_nchw.reshape(NR, HW)

    # Pad to (sublane, lane)-aligned extents so tiles never fall back to
    # full-extent blocks (zero padding -> stats unaffected, output sliced back).
    NR_pad = _round_up(NR, sub)
    HW_pad = _round_up(HW, 128)
    padded = (NR_pad, HW_pad) != (NR, HW)
    if padded:
        x2 = jnp.pad(x2, ((0, NR_pad - NR), (0, HW_pad - HW)))

    rt, lt = _choose_tiles(NR_pad, HW_pad, itemsize, sub)

    if initialized == 0:
        # Data-dependent init: single-pass sum / sum-of-squares in f32.
        ch_sum, ch_sumsq = _channel_stats(x2, N, C, NR, rt, lt)
        mean = ch_sum / M
        var = (ch_sumsq - M * mean * mean) / (M - 1.0)   # unbiased, like torch.std
        std = jnp.sqrt(jnp.maximum(var, 0.0))
        loc_c = -mean                                    # (C,) f32
        scale_c = 1.0 / (std + 1e-6)                     # (C,) f32
    else:
        loc_c = loc_param.reshape(C).astype(jnp.float32)
        scale_c = scale_param.reshape(C).astype(jnp.float32)

    # Per-row (batch*channel) fused params, row = n*C + c.  Tiny array.
    loc_rows = jnp.tile(loc_c, N)
    scale_rows = jnp.tile(scale_c, N)
    if NR_pad != NR:
        loc_rows = jnp.pad(loc_rows, (0, NR_pad - NR))
        scale_rows = jnp.pad(scale_rows, (0, NR_pad - NR))
    params_rows = jnp.stack([loc_rows, scale_rows], axis=1)   # (NR_pad, 2) f32

    out2 = _apply_affine(x2, params_rows, rt, lt)
    if padded:
        out2 = out2[:NR, :HW]
    out = out2.reshape(N, C, H, W)

    # Tiny per-channel finish in plain JAX.
    logdet = (H * W) * jnp.sum(jnp.log(jnp.abs(scale_c)))

    new_loc = loc_c.reshape(1, C, 1, 1)
    new_scale = scale_c.reshape(1, C, 1, 1)
    # TODO(synk): PyTorch mutates self.loc/self.scale/self.initialized in place;
    # here the updated values are returned for the caller to carry.
    return out, logdet, new_loc, new_scale


# ---------------------------------------------------------------------------
# Pure-JAX reference (mirrors the PyTorch module) + self-check
# ---------------------------------------------------------------------------

def _reference(x, loc, scale, initialized):
    N, C, H, W = x.shape
    if initialized == 0:
        flat = jnp.transpose(x, (1, 0, 2, 3)).reshape(C, -1)
        mean = flat.mean(axis=1).reshape(1, C, 1, 1)
        std = jnp.std(flat, axis=1, ddof=1).reshape(1, C, 1, 1)
        loc = -mean
        scale = 1.0 / (std + 1e-6)
    out = scale * (x + loc)
    logdet = H * W * jnp.sum(jnp.log(jnp.abs(scale)))
    return out, logdet, loc, scale


if __name__ == "__main__":
    key = jax.random.PRNGKey(0)
    N, C, H, W = 2, 4, 16, 16
    x = jax.random.normal(key, (N, C, H, W), dtype=jnp.float32) * 2.0 + 0.5

    # Parameters as in ActNorm.__init__ (deterministic, no checkpoint).
    loc = jnp.zeros((1, C, 1, 1), dtype=jnp.float32)
    scale = jnp.ones((1, C, 1, 1), dtype=jnp.float32)

    # 1) Fresh module -> data-dependent init happens on this forward.
    out, logdet, new_loc, new_scale = actnorm_forward(x, loc, scale, initialized=0)
    jax.block_until_ready((out, logdet, new_loc, new_scale))

    ref_out, ref_logdet, ref_loc, ref_scale = _reference(x, loc, scale, 0)
    assert jnp.allclose(out, ref_out, atol=1e-4, rtol=1e-4)
    assert jnp.allclose(logdet, ref_logdet, atol=1e-3, rtol=1e-4)
    assert jnp.allclose(new_loc, ref_loc, atol=1e-5, rtol=1e-5)
    assert jnp.allclose(new_scale, ref_scale, atol=1e-5, rtol=1e-5)

    # 2) Steady-state forward (initialized == 1): no stats pass is traced.
    out2, logdet2, _, _ = actnorm_forward(x, new_loc, new_scale, initialized=1)
    jax.block_until_ready((out2, logdet2))

    ref_out2, ref_logdet2, _, _ = _reference(x, new_loc, new_scale, 1)
    assert jnp.allclose(out2, ref_out2, atol=1e-4, rtol=1e-4)
    assert jnp.allclose(logdet2, ref_logdet2, atol=1e-3, rtol=1e-4)

    print("KERNEL_OK")
</pallas_src>

<mosaic_0001>
module attributes {stable_mosaic.version = 11 : i64} {
  func.func @_stats_kernel(%arg0: i32, %arg1: i32, %arg2: i32, %arg3: memref<8x256xf32, #tpu.memory_space<vmem>>, %arg4: memref<1x8x1xf32, #tpu.memory_space<vmem>>, %arg5: memref<1x8x1xf32, #tpu.memory_space<vmem>>, %arg6: memref<8x128xf32, #tpu.memory_space<vmem>>, %arg7: memref<8x128xf32, #tpu.memory_space<vmem>>) attributes {dimension_semantics = [#tpu.dimension_semantics<parallel>, #tpu.dimension_semantics<parallel>, #tpu.dimension_semantics<arbitrary>], iteration_bounds = array<i64: 1, 1, 1>, scalar_prefetch = 0 : i64, scratch_operands = 2 : i64, tpu.core_type = #tpu.core_type<tc>, window_params = [{transform_indices = @transform_0, window_bounds = array<i64: 8, 256>}, {transform_indices = @transform_1, window_bounds = array<i64: 1, 8, 1>}, {transform_indices = @transform_2, window_bounds = array<i64: 1, 8, 1>}]} {
    %c0_i32 = arith.constant 0 : i32
    %0 = arith.cmpi eq, %arg2, %c0_i32 : i32
    %1 = arith.extui %0 : i1 to i32
    %c0_i32_0 = arith.constant 0 : i32
    %2 = arith.cmpi ne, %1, %c0_i32_0 : i32
    scf.if %2 {
      %cst = arith.constant 0.000000e+00 : f32
      %22 = vector.broadcast %cst : f32 to vector<8x128xf32>
      %c0_21 = arith.constant 0 : index
      %c0_22 = arith.constant 0 : index
      %23 = vector.load %arg6[%c0_21, %c0_22] : memref<8x128xf32, #tpu.memory_space<vmem>>, vector<8x128xf32>
      tpu.vector_store %arg6[%c0_21, %c0_22], %22 {strides = array<i32>} : memref<8x128xf32, #tpu.memory_space<vmem>>, vector<8x128xf32>,
      %cst_23 = arith.constant 0.000000e+00 : f32
      %24 = vector.broadcast %cst_23 : f32 to vector<8x128xf32>
      %c0_24 = arith.constant 0 : index
      %c0_25 = arith.constant 0 : index
      %25 = vector.load %arg7[%c0_24, %c0_25] : memref<8x128xf32, #tpu.memory_space<vmem>>, vector<8x128xf32>
      tpu.vector_store %arg7[%c0_24, %c0_25], %24 {strides = array<i32>} : memref<8x128xf32, #tpu.memory_space<vmem>>, vector<8x128xf32>,
    } else {
    }
    %c0 = arith.constant 0 : index
    %c0_1 = arith.constant 0 : index
    %3 = vector.load %arg3[%c0, %c0_1] : memref<8x256xf32, #tpu.memory_space<vmem>>, vector<8x128xf32>
    %c0_2 = arith.constant 0 : index
    %c0_3 = arith.constant 0 : index
    %4 = vector.load %arg6[%c0_2, %c0_3] : memref<8x128xf32, #tpu.memory_space<vmem>>, vector<8x128xf32>
    %5 = arith.addf %4, %3 : vector<8x128xf32>
    %c0_4 = arith.constant 0 : index
    %c0_5 = arith.constant 0 : index
    %6 = vector.load %arg6[%c0_4, %c0_5] : memref<8x128xf32, #tpu.memory_space<vmem>>, vector<8x128xf32>
    tpu.vector_store %arg6[%c0_4, %c0_5], %5 {strides = array<i32>} : memref<8x128xf32, #tpu.memory_space<vmem>>, vector<8x128xf32>,
    %c0_6 = arith.constant 0 : index
    %c0_7 = arith.constant 0 : index
    %7 = vector.load %arg7[%c0_6, %c0_7] : memref<8x128xf32, #tpu.memory_space<vmem>>, vector<8x128xf32>
    %8 = arith.mulf %3, %3 : vector<8x128xf32>
    %9 = arith.addf %7, %8 : vector<8x128xf32>
    %c0_8 = arith.constant 0 : index
    %c0_9 = arith.constant 0 : index
    %10 = vector.load %arg7[%c0_8, %c0_9] : memref<8x128xf32, #tpu.memory_space<vmem>>, vector<8x128xf32>
    tpu.vector_store %arg7[%c0_8, %c0_9], %9 {strides = array<i32>} : memref<8x128xf32, #tpu.memory_space<vmem>>, vector<8x128xf32>,
    %c0_10 = arith.constant 0 : index
    %c128 = arith.constant 128 : index
    %11 = vector.load %arg3[%c0_10, %c128] : memref<8x256xf32, #tpu.memory_space<vmem>>, vector<8x128xf32>
    %c0_11 = arith.constant 0 : index
    %c0_12 = arith.constant 0 : index
    %12 = vector.load %arg6[%c0_11, %c0_12] : memref<8x128xf32, #tpu.memory_space<vmem>>, vector<8x128xf32>
    %13 = arith.addf %12, %11 : vector<8x128xf32>
    %c0_13 = arith.constant 0 : index
    %c0_14 = arith.constant 0 : index
    %14 = vector.load %arg6[%c0_13, %c0_14] : memref<8x128xf32, #tpu.memory_space<vmem>>, vector<8x128xf32>
    tpu.vector_store %arg6[%c0_13, %c0_14], %13 {strides = array<i32>} : memref<8x128xf32, #tpu.memory_space<vmem>>, vector<8x128xf32>,
    %c0_15 = arith.constant 0 : index
    %c0_16 = arith.constant 0 : index
    %15 = vector.load %arg7[%c0_15, %c0_16] : memref<8x128xf32, #tpu.memory_space<vmem>>, vector<8x128xf32>
    %16 = arith.mulf %11, %11 : vector<8x128xf32>
    %17 = arith.addf %15, %16 : vector<8x128xf32>
    %c0_17 = arith.constant 0 : index
    %c0_18 = arith.constant 0 : index
    %18 = vector.load %arg7[%c0_17, %c0_18] : memref<8x128xf32, #tpu.memory_space<vmem>>, vector<8x128xf32>
    tpu.vector_store %arg7[%c0_17, %c0_18], %17 {strides = array<i32>} : memref<8x128xf32, #tpu.memory_space<vmem>>, vector<8x128xf32>,
    %c0_i32_19 = arith.constant 0 : i32
    %19 = arith.cmpi eq, %arg2, %c0_i32_19 : i32
    %20 = arith.extui %19 : i1 to i32
    %c0_i32_20 = arith.constant 0 : i32
    %21 = arith.cmpi ne, %20, %c0_i32_20 : i32
    scf.if %21 {
      %c0_21 = arith.constant 0 : index
      %c0_22 = arith.constant 0 : index
      %22 = vector.load %arg6[%c0_21, %c0_22] : memref<8x128xf32, #tpu.memory_space<vmem>>, vector<8x128xf32>
      %cst = arith.constant dense<0.000000e+00> : vector<8xf32>
      %23 = vector.multi_reduction <add>, %22, %cst [1] : vector<8x128xf32> to vector<8xf32>
      %24 = vector.shape_cast %23 : vector<8xf32> to vector<8x1xf32>
      %c0_23 = arith.constant 0 : index
      %c0_24 = arith.constant 0 : index
      %c0_25 = arith.constant 0 : index
      %25 = vector.load %arg4[%c0_23, %c0_24, %c0_25] : memref<1x8x1xf32, #tpu.memory_space<vmem>>, vector<1x8x1xf32>
      %26 = vector.shape_cast %25 : vector<1x8x1xf32> to vector<8x1xf32>
      %27 = vector.shape_cast %24 : vector<8x1xf32> to vector<1x8x1xf32>
      tpu.vector_store %arg4[%c0_23, %c0_24, %c0_25], %27 {strides = array<i32>} : memref<1x8x1xf32, #tpu.memory_space<vmem>>, vector<1x8x1xf32>,
      %c0_26 = arith.constant 0 : index
      %c0_27 = arith.constant 0 : index
      %28 = vector.load %arg7[%c0_26, %c0_27] : memref<8x128xf32, #tpu.memory_space<vmem>>, vector<8x128xf32>
      %cst_28 = arith.constant dense<0.000000e+00> : vector<8xf32>
      %29 = vector.multi_reduction <add>, %28, %cst_28 [1] : vector<8x128xf32> to vector<8xf32>
      %30 = vector.shape_cast %29 : vector<8xf32> to vector<8x1xf32>
      %c0_29 = arith.constant 0 : index
      %c0_30 = arith.constant 0 : index
      %c0_31 = arith.constant 0 : index
      %31 = vector.load %arg5[%c0_29, %c0_30, %c0_31] : memref<1x8x1xf32, #tpu.memory_space<vmem>>, vector<1x8x1xf32>
      %32 = vector.shape_cast %31 : vector<1x8x1xf32> to vector<8x1xf32>
      %33 = vector.shape_cast %30 : vector<8x1xf32> to vector<1x8x1xf32>
      tpu.vector_store %arg5[%c0_29, %c0_30, %c0_31], %33 {strides = array<i32>} : memref<1x8x1xf32, #tpu.memory_space<vmem>>, vector<1x8x1xf32>,
    } else {
    }
    return
  }
  func.func @transform_0(%arg0: i32, %arg1: i32, %arg2: i32) -> (i32, i32) {
    %c1_i32 = arith.constant 1 : i32
    %0 = arith.muli %arg1, %c1_i32 : i32
    %1 = arith.addi %0, %arg2 : i32
    %c0_i32 = arith.constant 0 : i32
    return %arg0, %1 : i32, i32
  }
  func.func @transform_1(%arg0: i32, %arg1: i32, %arg2: i32) -> (i32, i32, i32) {
    %c0_i32 = arith.constant 0 : i32
    %c0_i32_0 = arith.constant 0 : i32
    return %arg1, %arg0, %c0_i32 : i32, i32, i32
  }
  func.func @transform_2(%arg0: i32, %arg1: i32, %arg2: i32) -> (i32, i32, i32) {
    %c0_i32 = arith.constant 0 : i32
    %c0_i32_0 = arith.constant 0 : i32
    return %arg1, %arg0, %c0_i32 : i32, i32, i32
  }
}

</mosaic_0001>

<bundles_post_ra>
// kernel: tpu_custom_call.1
= control target key start
LH: loop header
LB: loop body
LE: loop exit
PB: predicated region body
PF: predicated region fallthrough
CT: control target
= control target key end

     0   :  { %8 = vsyncpa [#allocation5], 0  ;;  %s96_s9 = smov [#allocation4]   ;;  %s130_s0 = inlined_call_operand.hbm [shape: f32[8,256], index: 0, kind: input, shape index: {}]   ;;  %s131_s1 = inlined_call_operand.vmem [shape: f32[1,8,1], index: 1, kind: output, shape index: {0}]   ;;  %s132_s2 = inlined_call_operand.vmem [shape: f32[1,8,1], index: 2, kind: output, shape index: {1}]  }
   0x1   :  { %s19_s10 = sshll.u32 %s96_s9, 4  ;;  %s72_s13 = scalar_lea.hbm %s130_s0, 256  ;;  %s20_s10 = int_to_ptr.vmem [resolvable:$true] %s19_s10 }
   0x2   :  { %p73_p0 = scmp.ne.s32.totalorder %s130_s0, %s72_s13  ;;  %p76_p1 = scmp.lt.u32.totalorder %s72_s13, %s130_s0 }
   0x4   :  { %p78_p2 = pnand %p76_p1, %p73_p0 }
   0x6   :  { %81 = shalt.err (!%p78_p2)
}
   0x7   :  { %s82_s18 = scalar_lea.vmem %s20_s10, 256  ;;  %p87_p4 = scmp.lt.s32.totalorder %s20_s10, %s20_s10 }
   0x8   :  { %p83_p3 = scmp.ne.s32.totalorder %s20_s10, %s82_s18  ;;  %p88_p5 = scmp.lt.s32.totalorder %s82_s18, %s82_s18 }
   0xa   :  { %p89_p6 = por %p88_p5, %p87_p4 }
   0xc   :  { %p90_p7 = pnand %p89_p6, %p83_p3 }
   0xe   :  { %93 = shalt.err (!%p90_p7)
}
   0xf   :  { %22 = dma.hbm_to_vmem [thread:$0]  %s130_s0, 256, %s20_s10, [#allocation5]  }
  0x10   :  { %94 = dma.done.wait [#allocation5], 256  }
  0x11   :  { %95 = vsyncadd [#allocation5], 4294967040  ;;  %v34_v0 = vld [vmem:[#allocation4] sm:$0xff]  ;;  %v42_v1 = vld [vmem:[#allocation4 + $0x8] sm:$0xff]  ;;  %vm56_vm0 = vcmask 7168  }
  0x12   :  { %v44_v2 = vadd.f32 %v42_v1, %v34_v0  ;;  %v47_v3 = vmul.f32 %v42_v1, %v42_v1  ;;  %v39_v4 = vmul.f32 %v34_v0, %v34_v0 }
  0x14   :  { %54 = vadd.xlane.f32.xlu0 %v44_v2  ;;  %v48_v5 = vadd.f32 %v47_v3, %v39_v4 }
  0x18   :  { %59 = vadd.xlane.f32.xlu0 %v48_v5 }
  0xa1   :  { %v55_v6 = vpop.xlane.xlu0 %54 }
  0xa2   :  { %57 = vst.msk [vmem:[%s131_s1] sm:$0xff] %vm56_vm0, %v55_v6 }
  0xa5   :  { %v60_v7 = vpop.xlane.xlu0 %59 }
  0xa6   :  { %61 = vst.msk [vmem:[%s132_s2] sm:$0xff] %vm56_vm0, %v60_v7 }
  0xa7   :  { %70 = vsyncpa [#allocation5], 1 }

</bundles_post_ra>
